<compile_context>
chip_gen: v7x
topology: tpu7x:2x2x1
jax: 0.10.0
libtpu: 0.0.40
codegen_flags: <defaults>
</compile_context>

<pallas_src>
import functools

import jax
import jax.numpy as jnp
import numpy as np
from jax import lax
from jax.experimental import pallas as pl
from jax.experimental.pallas import tpu as pltpu


# ----------------------------- Pallas kernels --------------------------------

def lstm_proj_kernel(x_ref, w_ih_ref, b_ref, gx_ref):
    """gx = x @ [W_ih_f | W_ih_b] + [b_f | b_b]   (one row tile per grid step).

    x_ref:    (TM, C)        time-major rows (row = t*Bp + b), batch padded
    w_ih_ref: (C, 8*Hp)      both directions' gate-padded input weights
    b_ref:    (1, 8*Hp)      combined biases (b_ih + b_hh), f32
    gx_ref:   (TM, 8*Hp)     output, stored in the matmul compute dtype
    """
    gx_ref[...] = (
        jnp.dot(x_ref[...], w_ih_ref[...], preferred_element_type=jnp.float32)
        + b_ref[...]).astype(gx_ref.dtype)


def bilstm_recurrence_kernel(gx_f_ref, gx_b_ref, w_hh_ref, h_f_ref, h_b_ref,
                             h_state, c_state, *, Tc, Hp, unroll):
    """Fused forward+backward LSTM recurrence over one time chunk.

    gx_f_ref: (Tc, Bp, 4*Hp)  forward gates-from-x, chunk c (real time order)
    gx_b_ref: (Tc, Bp, 4*Hp)  backward gates-from-x, chunk nC-1-c
    w_hh_ref: (2, Hp, 4*Hp)   recurrent weights [forward, backward]
    h_f_ref:  (Tc, Bp, Hp)    forward hidden output, chunk c
    h_b_ref:  (Tc, Bp, Hp)    backward hidden output, chunk nC-1-c
    h_state,
    c_state:  (2, Bp, Hp) f32 VMEM scratch carrying state across chunks
    """
    c_idx = pl.program_id(0)

    @pl.when(c_idx == 0)
    def _():
        h_state[...] = jnp.zeros_like(h_state)
        c_state[...] = jnp.zeros_like(c_state)

    w_hh_f = w_hh_ref[0]              # hoisted out of the time loop
    w_hh_b = w_hh_ref[1]
    mdt = w_hh_f.dtype                # matmul operand dtype (f32 or bf16)

    def lstm_cell(gates, c):
        i = jax.nn.sigmoid(gates[:, 0 * Hp:1 * Hp])
        f = jax.nn.sigmoid(gates[:, 1 * Hp:2 * Hp])
        g = jnp.tanh(gates[:, 2 * Hp:3 * Hp])
        o = jax.nn.sigmoid(gates[:, 3 * Hp:4 * Hp])
        c_new = f * c + i * g
        h_new = o * jnp.tanh(c_new)
        return h_new, c_new

    def step(t, carry):
        h_f, c_f, h_b, c_b = carry
        rb = Tc - 1 - t               # reversed local index for backward dir
        # Two independent dependency chains issued per step (latency hiding).
        gates_f = gx_f_ref[t].astype(jnp.float32) + jnp.dot(
            h_f.astype(mdt), w_hh_f, preferred_element_type=jnp.float32)
        gates_b = gx_b_ref[rb].astype(jnp.float32) + jnp.dot(
            h_b.astype(mdt), w_hh_b, preferred_element_type=jnp.float32)
        h_f, c_f = lstm_cell(gates_f, c_f)
        h_b, c_b = lstm_cell(gates_b, c_b)
        h_f_ref[t] = h_f.astype(h_f_ref.dtype)
        h_b_ref[rb] = h_b.astype(h_b_ref.dtype)
        return h_f, c_f, h_b, c_b

    carry0 = (h_state[0], c_state[0], h_state[1], c_state[1])
    h_f, c_f, h_b, c_b = lax.fori_loop(0, Tc, step, carry0, unroll=unroll)
    h_state[0] = h_f
    c_state[0] = c_f
    h_state[1] = h_b
    c_state[1] = c_b


def fc_kernel(hf_ref, hb_ref, wf_ref, wb_ref, b_ref, out_ref):
    """Fused final Linear: out = h_f @ Wf + h_b @ Wb + b, lane-dense store.

    hf_ref/hb_ref: (TM, Hp)   per-direction hidden states (row tile)
    wf_ref/wb_ref: (Hp, Op)   per-direction FC weights (padded rows/cols zero)
    b_ref:         (1, Op)    f32 bias (padded cols zero)
    out_ref:       (TM, Op)   f32 output (Op multiple of 128)
    """
    acc = jnp.dot(hf_ref[...], wf_ref[...], preferred_element_type=jnp.float32)
    acc = acc + jnp.dot(hb_ref[...], wb_ref[...],
                        preferred_element_type=jnp.float32)
    out_ref[...] = acc + b_ref[...]


# ------------------------------ wrapper ---------------------------------------

def _round_up(n, m):
    return ((n + m - 1) // m) * m


def _largest_divisor_leq(n, cap):
    cap = max(1, min(n, cap))
    for d in range(cap, 0, -1):
        if n % d == 0:
            return d
    return 1


def _vmem_limit_bytes(est):
    return int(min(max(2 * est, 16 * 2 ** 20), 64 * 2 ** 20))


def bilstm_forward(x, kparams, compute_dtype=jnp.float32):
    """x: (B, T, C_in) batch-first, like the PyTorch module."""
    B, T, C = x.shape
    Hp = int(kparams["hidden_padded"])
    O = int(kparams["out_features"])
    Op = int(kparams["out_padded"])
    cdt = compute_dtype
    itemsize = jnp.dtype(cdt).itemsize

    Bp = _round_up(B, 8)              # sublane-aligned batch
    TBp = T * Bp

    # Time-major, batch-padded input (padded rows are zero and stay inert).
    xp = jnp.zeros((T, Bp, C), cdt)
    xp = xp.at[:, :B, :].set(jnp.transpose(x, (1, 0, 2)).astype(cdt))
    x2d = xp.reshape(TBp, C)

    w_ih = kparams["w_ih_both"].astype(cdt)        # (C, 8Hp)
    b_ih = kparams["b_both"].astype(jnp.float32)   # (1, 8Hp)
    w_hh = kparams["w_hh_all"].astype(cdt)         # (2, Hp, 4Hp)
    w_fc_f = kparams["w_fc_f"].astype(cdt)         # (Hp, Op)
    w_fc_b = kparams["w_fc_b"].astype(cdt)         # (Hp, Op)
    b_fc = kparams["b_fc"].astype(jnp.float32)     # (1, Op)

    # ---------------- Kernel 1: tiled input projection -----------------------
    Tt = _largest_divisor_leq(T, max(1, 512 // Bp))
    TM = Tt * Bp
    nM = TBp // TM
    est_proj = 2 * (TM * C + C * 8 * Hp + 8 * Hp + TM * 8 * Hp) * 4
    gx = pl.pallas_call(
        lstm_proj_kernel,
        out_shape=jax.ShapeDtypeStruct((TBp, 8 * Hp), cdt),
        grid=(nM,),
        in_specs=[
            pl.BlockSpec((TM, C), lambda m: (m, 0)),
            pl.BlockSpec((C, 8 * Hp), lambda m: (0, 0)),
            pl.BlockSpec((1, 8 * Hp), lambda m: (0, 0)),
        ],
        out_specs=pl.BlockSpec((TM, 8 * Hp), lambda m: (m, 0)),
        compiler_params=pltpu.CompilerParams(
            dimension_semantics=("parallel",),
            vmem_limit_bytes=_vmem_limit_bytes(est_proj)),
    )(x2d, w_ih, b_ih)
    gx3d = gx.reshape(T, Bp, 8 * Hp)   # free reshape (row-major contiguous)

    # ------------- Kernel 2: fused fwd+bwd recurrence, T-chunked -------------
    cap_t = max(1, (2 * 2 ** 20) // max(1, Bp * 4 * Hp * itemsize))
    Tc = _largest_divisor_leq(T, cap_t)
    nC = T // Tc
    unroll = int(min(Tc, 8))
    est_rec = (2 * 2 * Tc * Bp * 4 * Hp * itemsize      # two gx views, 2-buf
               + 2 * 2 * Hp * 4 * Hp * itemsize          # W_hh
               + 2 * 2 * Tc * Bp * Hp * itemsize         # two h outputs, 2-buf
               + 2 * 2 * Bp * Hp * 4)                    # h/c state scratch
    h_f, h_b = pl.pallas_call(
        functools.partial(bilstm_recurrence_kernel, Tc=Tc, Hp=Hp,
                          unroll=unroll),
        out_shape=(jax.ShapeDtypeStruct((T, Bp, Hp), cdt),
                   jax.ShapeDtypeStruct((T, Bp, Hp), cdt)),
        grid=(nC,),
        in_specs=[
            # forward gates: time chunk c, columns [0, 4Hp)
            pl.BlockSpec((Tc, Bp, 4 * Hp), lambda c: (c, 0, 0)),
            # backward gates: time chunk nC-1-c, columns [4Hp, 8Hp)
            pl.BlockSpec((Tc, Bp, 4 * Hp), lambda c: (nC - 1 - c, 0, 1)),
            pl.BlockSpec((2, Hp, 4 * Hp), lambda c: (0, 0, 0)),
        ],
        out_specs=(pl.BlockSpec((Tc, Bp, Hp), lambda c: (c, 0, 0)),
                   pl.BlockSpec((Tc, Bp, Hp), lambda c: (nC - 1 - c, 0, 0))),
        scratch_shapes=[pltpu.VMEM((2, Bp, Hp), jnp.float32),
                        pltpu.VMEM((2, Bp, Hp), jnp.float32)],
        compiler_params=pltpu.CompilerParams(
            dimension_semantics=("arbitrary",),
            vmem_limit_bytes=_vmem_limit_bytes(est_rec)),
    )(gx3d, gx3d, w_hh)

    # ---------------- Kernel 3: tiled, lane-padded final Linear --------------
    hf2d = h_f.reshape(TBp, Hp)
    hb2d = h_b.reshape(TBp, Hp)
    est_fc = 2 * (2 * TM * Hp * itemsize + 2 * Hp * Op * itemsize
                  + Op * 4 + TM * Op * 4)
    out2d = pl.pallas_call(
        fc_kernel,
        out_shape=jax.ShapeDtypeStruct((TBp, Op), jnp.float32),
        grid=(nM,),
        in_specs=[
            pl.BlockSpec((TM, Hp), lambda m: (m, 0)),
            pl.BlockSpec((TM, Hp), lambda m: (m, 0)),
            pl.BlockSpec((Hp, Op), lambda m: (0, 0)),
            pl.BlockSpec((Hp, Op), lambda m: (0, 0)),
            pl.BlockSpec((1, Op), lambda m: (0, 0)),
        ],
        out_specs=pl.BlockSpec((TM, Op), lambda m: (m, 0)),
        compiler_params=pltpu.CompilerParams(
            dimension_semantics=("parallel",),
            vmem_limit_bytes=_vmem_limit_bytes(est_fc)),
    )(hf2d, hb2d, w_fc_f, w_fc_b, b_fc)

    out = out2d.reshape(T, Bp, Op)[:, :B, :O]        # drop batch/lane padding
    return jnp.transpose(out, (1, 0, 2))             # (B, T, O)


# ------------------------- parameter construction -----------------------------

def _pad_gate_cols(w, H, Hp):
    """(rows, 4H) -> (rows, 4Hp): each H-wide gate block starts at g*Hp."""
    rows = w.shape[0]
    out = jnp.zeros((rows, 4 * Hp), w.dtype)
    for g in range(4):
        out = out.at[:, g * Hp:g * Hp + H].set(w[:, g * H:(g + 1) * H])
    return out


def _pad_rows(w, H, Hp):
    """(H, cols) -> (Hp, cols) with zero rows for padding lanes."""
    return jnp.zeros((Hp, w.shape[1]), w.dtype).at[:H].set(w)


def make_kernel_params(raw, H, O):
    """Pre-transpose, gate/lane-pad (H -> Hp, O -> Op multiples of 128)."""
    Hp = _round_up(H, 128)
    Op = _round_up(O, 128)

    def dir_ih(w_ih, b_ih, b_hh):
        w = _pad_gate_cols(w_ih.T, H, Hp)                                # (C, 4Hp)
        b = _pad_gate_cols((b_ih + b_hh).reshape(1, 4 * H), H, Hp)       # (1, 4Hp)
        return w, b

    wf_ih, bf = dir_ih(raw["w_ih_f"], raw["b_ih_f"], raw["b_hh_f"])
    wb_ih, bb = dir_ih(raw["w_ih_b"], raw["b_ih_b"], raw["b_hh_b"])
    w_ih_both = jnp.concatenate([wf_ih, wb_ih], axis=1)                  # (C, 8Hp)
    b_both = jnp.concatenate([bf, bb], axis=1)                           # (1, 8Hp)

    whf = _pad_rows(_pad_gate_cols(raw["w_hh_f"].T, H, Hp), H, Hp)       # (Hp, 4Hp)
    whb = _pad_rows(_pad_gate_cols(raw["w_hh_b"].T, H, Hp), H, Hp)
    w_hh_all = jnp.stack([whf, whb])                                     # (2, Hp, 4Hp)

    def pad_fc(w):                                                       # (H, O) -> (Hp, Op)
        return jnp.zeros((Hp, Op), w.dtype).at[:H, :O].set(w)

    w_fc_f = pad_fc(raw["w_fc"][:, :H].T)
    w_fc_b = pad_fc(raw["w_fc"][:, H:].T)
    b_fc = jnp.zeros((1, Op), jnp.float32).at[0, :O].set(raw["b_fc"])

    return dict(
        w_ih_both=w_ih_both, b_both=b_both, w_hh_all=w_hh_all,
        w_fc_f=w_fc_f, w_fc_b=w_fc_b, b_fc=b_fc,
        hidden_padded=Hp, out_features=O, out_padded=Op,
    )


def init_params(key, in_channel, hidden_channel, out_channel):
    """Deterministic init, mirroring PyTorch parameter shapes/distributions."""
    H, C, O = hidden_channel, in_channel, out_channel
    ks = jax.random.split(key, 10)
    k_lstm = 1.0 / np.sqrt(H)
    k_fc = 1.0 / np.sqrt(2 * H)
    u = lambda k, shape, s: jax.random.uniform(k, shape, jnp.float32, -s, s)

    raw = dict(
        w_ih_f=u(ks[0], (4 * H, C), k_lstm), w_hh_f=u(ks[1], (4 * H, H), k_lstm),
        b_ih_f=u(ks[2], (4 * H,), k_lstm),   b_hh_f=u(ks[3], (4 * H,), k_lstm),
        w_ih_b=u(ks[4], (4 * H, C), k_lstm), w_hh_b=u(ks[5], (4 * H, H), k_lstm),
        b_ih_b=u(ks[6], (4 * H,), k_lstm),   b_hh_b=u(ks[7], (4 * H,), k_lstm),
        w_fc=u(ks[8], (O, 2 * H), k_fc),     b_fc=u(ks[9], (O,), k_fc),
    )
    return raw, make_kernel_params(raw, H, O)


# ------------------------- pure-JAX reference ----------------------------------

def bilstm_ref(x, raw, hidden_channel):
    H = hidden_channel
    B = x.shape[0]
    xs = jnp.transpose(x, (1, 0, 2))  # (T, B, C)
    hi = jax.lax.Precision.HIGHEST

    def run(xseq, w_ih, w_hh, b_ih, b_hh):
        def step(carry, xt):
            h, c = carry
            gates = (jnp.dot(xt, w_ih.T, precision=hi)
                     + jnp.dot(h, w_hh.T, precision=hi) + b_ih + b_hh)
            i = jax.nn.sigmoid(gates[:, 0:H])
            f = jax.nn.sigmoid(gates[:, H:2 * H])
            g = jnp.tanh(gates[:, 2 * H:3 * H])
            o = jax.nn.sigmoid(gates[:, 3 * H:4 * H])
            c = f * c + i * g
            h = o * jnp.tanh(c)
            return (h, c), h
        init = (jnp.zeros((B, H), jnp.float32), jnp.zeros((B, H), jnp.float32))
        _, hs = lax.scan(step, init, xseq)
        return hs

    hf = run(xs, raw["w_ih_f"], raw["w_hh_f"], raw["b_ih_f"], raw["b_hh_f"])
    hb = run(xs[::-1], raw["w_ih_b"], raw["w_hh_b"],
             raw["b_ih_b"], raw["b_hh_b"])[::-1]
    h = jnp.concatenate([hf, hb], axis=-1)           # (T, B, 2H)
    out = jnp.dot(h, raw["w_fc"].T, precision=hi) + raw["b_fc"]
    return jnp.transpose(out, (1, 0, 2))             # (B, T, O)


# ---------------------------------- main ----------------------------------------

if __name__ == "__main__":
    B, T = 2, 8
    in_channel, hidden_channel, out_channel = 16, 32, 16

    key = jax.random.PRNGKey(0)
    kx, kp = jax.random.split(key)
    x = jax.random.normal(kx, (B, T, in_channel), jnp.float32)

    raw, kparams = init_params(kp, in_channel, hidden_channel, out_channel)
    ref = jax.block_until_ready(bilstm_ref(x, raw, hidden_channel))

    # f32 matmul operands: strict check against the HIGHEST-precision reference.
    out_f32 = jax.block_until_ready(
        bilstm_forward(x, kparams, compute_dtype=jnp.float32))
    assert out_f32.shape == (B, T, out_channel), out_f32.shape
    np.testing.assert_allclose(np.asarray(out_f32), np.asarray(ref),
                               rtol=1e-3, atol=1e-3)

    # bf16 matmul operands + bf16 gx/h storage, f32 accumulation: looser check.
    out_bf16 = jax.block_until_ready(
        bilstm_forward(x, kparams, compute_dtype=jnp.bfloat16))
    np.testing.assert_allclose(np.asarray(out_bf16), np.asarray(ref),
                               rtol=3e-2, atol=3e-2)

    print("KERNEL_OK")
</pallas_src>

<mosaic_0001>
module attributes {stable_mosaic.version = 11 : i64} {
  func.func @lstm_proj_kernel(%arg0: i32, %arg1: memref<64x16xf32, #tpu.memory_space<vmem>>, %arg2: memref<16x1024xf32, #tpu.memory_space<vmem>>, %arg3: memref<1x1024xf32, #tpu.memory_space<vmem>>, %arg4: memref<64x1024xf32, #tpu.memory_space<vmem>>) attributes {dimension_semantics = [#tpu.dimension_semantics<parallel>], iteration_bounds = array<i64: 1>, scalar_prefetch = 0 : i64, scratch_operands = 0 : i64, tpu.core_type = #tpu.core_type<tc>, window_params = [{transform_indices = @transform_0, window_bounds = array<i64: 64, 16>}, {pipeline_mode = #tpu.pipeline_mode<synchronous>, transform_indices = @transform_1, window_bounds = array<i64: 16, 1024>}, {pipeline_mode = #tpu.pipeline_mode<synchronous>, transform_indices = @transform_2, window_bounds = array<i64: 1, 1024>}, {transform_indices = @transform_3, window_bounds = array<i64: 64, 1024>}]} {
    %c0 = arith.constant 0 : index
    %c0_0 = arith.constant 0 : index
    %0 = vector.load %arg1[%c0, %c0_0] : memref<64x16xf32, #tpu.memory_space<vmem>>, vector<64x16xf32>
    %c0_1 = arith.constant 0 : index
    %c0_2 = arith.constant 0 : index
    %1 = vector.load %arg2[%c0_1, %c0_2] : memref<16x1024xf32, #tpu.memory_space<vmem>>, vector<16x1024xf32>
    %cst = arith.constant dense<0.000000e+00> : vector<64x1024xf32>
    %2 = tpu.matmul %0, %1, %cst {dimension_numbers = #tpu.dot_dimension_numbers<[1], [0], [0], [1], [0, 0, 1, 1], [], []>} : vector<64x16xf32>, vector<16x1024xf32>, vector<64x1024xf32> -> vector<64x1024xf32>
    %c0_3 = arith.constant 0 : index
    %c0_4 = arith.constant 0 : index
    %3 = vector.load %arg3[%c0_3, %c0_4] : memref<1x1024xf32, #tpu.memory_space<vmem>>, vector<1x1024xf32>
    %4 = vector.broadcast %3 : vector<1x1024xf32> to vector<64x1024xf32>
    %5 = arith.addf %2, %4 : vector<64x1024xf32>
    %c0_5 = arith.constant 0 : index
    %c0_6 = arith.constant 0 : index
    %6 = vector.load %arg4[%c0_5, %c0_6] : memref<64x1024xf32, #tpu.memory_space<vmem>>, vector<64x1024xf32>
    tpu.vector_store %arg4[%c0_5, %c0_6], %5 {strides = array<i32>} : memref<64x1024xf32, #tpu.memory_space<vmem>>, vector<64x1024xf32>,
    return
  }
  func.func @transform_0(%arg0: i32) -> (i32, i32) {
    %c0_i32 = arith.constant 0 : i32
    %c0_i32_0 = arith.constant 0 : i32
    return %arg0, %c0_i32 : i32, i32
  }
  func.func @transform_1(%arg0: i32) -> (i32, i32) {
    %c0_i32 = arith.constant 0 : i32
    %c0_i32_0 = arith.constant 0 : i32
    %c0_i32_1 = arith.constant 0 : i32
    return %c0_i32, %c0_i32_0 : i32, i32
  }
  func.func @transform_2(%arg0: i32) -> (i32, i32) {
    %c0_i32 = arith.constant 0 : i32
    %c0_i32_0 = arith.constant 0 : i32
    %c0_i32_1 = arith.constant 0 : i32
    return %c0_i32, %c0_i32_0 : i32, i32
  }
  func.func @transform_3(%arg0: i32) -> (i32, i32) {
    %c0_i32 = arith.constant 0 : i32
    %c0_i32_0 = arith.constant 0 : i32
    return %arg0, %c0_i32 : i32, i32
  }
}

</mosaic_0001>

<bundles_post_ra>
// kernel: tpu_custom_call.1
= control target key start
LH: loop header
LB: loop body
LE: loop exit
PB: predicated region body
PF: predicated region fallthrough
CT: control target
= control target key end

     0   :  { %8 = vsyncpa [#allocation3], 0  ;;  %s1006_s0 = inlined_call_operand.vmem [shape: f32[64,16], index: 0, kind: input, shape index: {}]   ;;  %s1007_s1 = inlined_call_operand.hbm [shape: f32[16,1024], index: 1, kind: input, shape index: {}]   ;;  %s1008_s2 = inlined_call_operand.vmem [shape: f32[1,1024], index: 2, kind: input, shape index: {}]   ;;  %s1009_s3 = inlined_call_operand.hbm [shape: f32[64,1024], index: 3, kind: output, shape index: {}]  }
   0x1   :  { %9 = vsyncpa [#allocation4], 0  ;;  %s754_s12 = smov [#allocation2]   ;;  %s706_s16 = scalar_lea.hbm %s1007_s1, 2048 }
   0x2   :  { %s17_s13 = sshll.u32 %s754_s12, 4  ;;  %p707_p0 = scmp.ne.s32.totalorder %s1007_s1, %s706_s16  ;;  %s18_s13 = int_to_ptr.vmem [resolvable:$true] %s17_s13 }
   0x3   :  { %p710_p1 = scmp.lt.u32.totalorder %s706_s16, %s1007_s1 }
   0x5   :  { %p712_p2 = pnand %p710_p1, %p707_p0 }
   0x7   :  { %715 = shalt.err (!%p712_p2)
}
   0x8   :  { %s716_s21 = scalar_lea.vmem %s18_s13, 2048  ;;  %p721_p4 = scmp.lt.s32.totalorder %s18_s13, %s18_s13 }
   0x9   :  { %p717_p3 = scmp.ne.s32.totalorder %s18_s13, %s716_s21  ;;  %p722_p5 = scmp.lt.s32.totalorder %s716_s21, %s716_s21 }
   0xb   :  { %p723_p6 = por %p722_p5, %p721_p4 }
   0xd   :  { %p724_p7 = pnand %p723_p6, %p717_p3 }
   0xf   :  { %727 = shalt.err (!%p724_p7)
}
  0x10   :  { %s755_s22 = smov 1024   ;;  %s756_s23 = smov 64  }
  0x11   :  { %23 = dma.hbm_to_vmem [thread:$0]  %s1007_s1, 2048, %s18_s13, [#allocation3], %s755_s22, %s755_s22, %s756_s23  }
  0x12   :  { %750 = dma.done.wait [#allocation3], 2048  }
  0x13   :  { %751 = vsyncadd [#allocation3], 4294965248  ;;  %v757_v0 = vmov 0.0   ;;  %v38_v1 = vld [vmem:[#allocation2 + $0x8] sm:$0xff]  ;;  %v40_v3 = vld [vmem:[#allocation2 + $0x18] sm:$0xff]  ;;  %vm95_vm0 = vcmask 130048   ;;  %v55_v33 = vlaneseq }
  0x14   :  { %184 = vmatprep.mubr.f32.mxu0 %v757_v0  ;;  %297 = vmatprep.mubr.f32.mxu1 %v757_v0  ;;  %v46_v2 = vld [vmem:[#allocation2 + $0x48] sm:$0xff]  ;;  %v48_v5 = vld [vmem:[#allocation2 + $0x58] sm:$0xff]  ;;  %v37_v6 = vld [vmem:[#allocation2] sm:$0xff] }
  0x15   :  { %v685_v4 = vpack.c.bf16 %v46_v2, %v38_v1  ;;  %v45_v7 = vld [vmem:[#allocation2 + $0x40] sm:$0xff]  ;;  %v689_v8 = vpack.c.bf16 %v48_v5, %v40_v3  ;;  %v39_v10 = vld [vmem:[#allocation2 + $0x10] sm:$0xff]  ;;  %v42_v14 = vld [vmem:[#allocation2 + $0x28] sm:$0xff]  ;;  %v888_v34 = vshrl.u32 %v55_v33, 7 }
  0x16   :  { %v687_v9 = vpack.c.bf16 %v45_v7, %v37_v6  ;;  %v47_v11 = vld [vmem:[#allocation2 + $0x50] sm:$0xff]  ;;  %v799_v12 = vld [vmem:[%s1006_s0] sm:$0xff]  ;;  %v50_v15 = vld [vmem:[#allocation2 + $0x68] sm:$0xff] }
  0x17   :  { %686 = vmatprep.subr.bf16.mxu0 %v685_v4  ;;  %v691_v13 = vpack.c.bf16 %v47_v11, %v39_v10  ;;  %v44_v16 = vld [vmem:[#allocation2 + $0x38] sm:$0xff]  ;;  %690 = vmatprep.subr.bf16.mxu1 %v689_v8  ;;  %v693_v17 = vpack.c.bf16 %v50_v15, %v42_v14  ;;  %v41_v19 = vld [vmem:[#allocation2 + $0x20] sm:$0xff]  ;;  %v43_v23 = vld [vmem:[#allocation2 + $0x30] sm:$0xff]  ;;  %v57_v35 = vsub.s32 0, %v888_v34  ;;  %v65_v37 = vsub.s32 2, %v888_v34 }
  0x18   :  { %688 = vmatpush1.bf16.msra.mxu0 %v687_v9  ;;  %v52_v18 = vld [vmem:[#allocation2 + $0x78] sm:$0xff]  ;;  %v49_v20 = vld [vmem:[#allocation2 + $0x60] sm:$0xff]  ;;  %v51_v24 = vld [vmem:[#allocation2 + $0x70] sm:$0xff]  ;;  %v61_v38 = vsub.s32 1, %v888_v34  ;;  %v69_v39 = vsub.s32 3, %v888_v34 }
  0x19   :  { %692 = vmatpush1.bf16.msra.mxu1 %v691_v13  ;;  %v697_v21 = vpack.c.bf16 %v52_v18, %v44_v16  ;;  %v695_v22 = vpack.c.bf16 %v49_v20, %v41_v19  ;;  %694 = vmatprep.subr.bf16.mxu0 %v693_v17  ;;  %v699_v25 = vpack.c.bf16 %v51_v24, %v43_v23  ;;  %v30_v26 = vld [vmem:[%s1006_s0 + $0x8] sm:$0xff]  ;;  %v31_v27 = vld [vmem:[%s1006_s0 + $0x10] sm:$0xff]  ;;  %v32_v28 = vld [vmem:[%s1006_s0 + $0x18] sm:$0xff] }
  0x1a   :  { %v33_v29 = vld [vmem:[%s1006_s0 + $0x20] sm:$0xff]  ;;  %v34_v30 = vld [vmem:[%s1006_s0 + $0x28] sm:$0xff]  ;;  %v35_v31 = vld [vmem:[%s1006_s0 + $0x30] sm:$0xff] }
  0x1b   :  { %653 = vmatmul.mubr.msk.f32.vlgmr.msra.gmra.mrb[0].mxu0 %vm95_vm0, %v799_v12  ;;  %698 = vmatprep.subr.bf16.mxu1 %v697_v21  ;;  %v36_v32 = vld [vmem:[%s1006_s0 + $0x38] sm:$0xff]  ;;  %v894_v36 = vld [vmem:[%s1008_s2] sm:$0xff]  ;;  %s758_s2 = smov [#allocation5]  }
  0x1c   :  { %661 = vmatmul.mubr.msk.f32.vlgmr.msra.gmra.mrb[0].mxu1 %vm95_vm0, %v799_v12  ;;  %696 = vmatpush1.bf16.msra.mxu0 %v695_v22  ;;  %v900_v40 = vrot.slane %v894_v36, %v57_v35  ;;  %v903_v41 = vrot.slane %v894_v36, %v65_v37  ;;  %v906_v42 = vrot.slane %v894_v36, %v61_v38  ;;  %v81_v38 = vsub.s32 6, %v888_v34  ;;  %s641_s15 = sshll.u32 %s758_s2, 4  ;;  %s642_s15 = int_to_ptr.vmem [resolvable:$true] %s641_s15 }
  0x1d   :  { %700 = vmatpush1.bf16.msra.mxu1 %v699_v25  ;;  %190 = vmatprep.mubr.f32.mxu0 %v757_v0  ;;  %v909_v43 = vrot.slane %v894_v36, %v69_v39  ;;  %v77_v39 = vsub.s32 5, %v888_v34  ;;  %s728_s16 = scalar_lea.vmem %s642_s15, 8192  ;;  %p733_p9 = scmp.lt.s32.totalorder %s642_s15, %s642_s15 }
  0x1e   :  { %303 = vmatprep.mubr.f32.mxu1 %v757_v0  ;;  %p729_p8 = scmp.ne.s32.totalorder %s642_s15, %s728_s16  ;;  %p734_p10 = scmp.lt.s32.totalorder %s728_s16, %s728_s16 }
  0x1f   :  { %654 = vmatmul.mubr.msk.f32.gmra.mrb[2].mxu0 %vm95_vm0, %v30_v26 }
  0x20   :  { %662 = vmatmul.mubr.msk.f32.gmra.mrb[2].mxu1 %vm95_vm0, %v30_v26  ;;  %196 = vmatprep.mubr.f32.mxu0 %v757_v0  ;;  %p735_p11 = por %p734_p10, %p733_p9 }
  0x21   :  { %309 = vmatprep.mubr.f32.mxu1 %v757_v0 }
  0x22   :  { %p736_p12 = pnand %p735_p11, %p729_p8 }
  0x23   :  { %655 = vmatmul.mubr.msk.f32.gmra.mrb[4].mxu0 %vm95_vm0, %v31_v27 }
  0x24   :  { %663 = vmatmul.mubr.msk.f32.gmra.mrb[4].mxu1 %vm95_vm0, %v31_v27  ;;  %202 = vmatprep.mubr.f32.mxu0 %v757_v0 }
  0x25   :  { %315 = vmatprep.mubr.f32.mxu1 %v757_v0 }
  0x27   :  { %656 = vmatmul.mubr.msk.f32.gmra.mrb[6].mxu0 %vm95_vm0, %v32_v28 }
  0x28   :  { %664 = vmatmul.mubr.msk.f32.gmra.mrb[6].mxu1 %vm95_vm0, %v32_v28  ;;  %208 = vmatprep.mubr.f32.mxu0 %v757_v0 }
  0x29   :  { %321 = vmatprep.mubr.f32.mxu1 %v757_v0 }
  0x2b   :  { %657 = vmatmul.mubr.msk.f32.gmra.mrb[8].mxu0 %vm95_vm0, %v33_v29 }
  0x2c   :  { %665 = vmatmul.mubr.msk.f32.gmra.mrb[8].mxu1 %vm95_vm0, %v33_v29  ;;  %214 = vmatprep.mubr.f32.mxu0 %v757_v0 }
  0x2d   :  { %327 = vmatprep.mubr.f32.mxu1 %v757_v0 }
  0x2f   :  { %658 = vmatmul.mubr.msk.f32.gmra.mrb[10].mxu0 %vm95_vm0, %v34_v30 }
  0x30   :  { %666 = vmatmul.mubr.msk.f32.gmra.mrb[10].mxu1 %vm95_vm0, %v34_v30  ;;  %220 = vmatprep.mubr.f32.mxu0 %v757_v0 }
  0x31   :  { %333 = vmatprep.mubr.f32.mxu1 %v757_v0 }
  0x33   :  { %659 = vmatmul.mubr.msk.f32.gmra.mrb[12].mxu0 %vm95_vm0, %v35_v31 }
  0x34   :  { %667 = vmatmul.mubr.msk.f32.gmra.mrb[12].mxu1 %vm95_vm0, %v35_v31  ;;  %226 = vmatprep.mubr.f32.mxu0 %v757_v0 }
  0x35   :  { %339 = vmatprep.mubr.f32.mxu1 %v757_v0 }
  0x37   :  { %660 = vmatmul.mubr.msk.f32.gmra.mrb[14].mxu0 %vm95_vm0, %v36_v32 }
  0x38   :  { %668 = vmatmul.mubr.msk.f32.gmra.mrb[14].mxu1 %vm95_vm0, %v36_v32  ;;  %410 = vmatprep.mubr.f32.mxu0 %v757_v0 }
  0x39   :  { %523 = vmatprep.mubr.f32.mxu1 %v757_v0 }
  0x3b   :  { %669 = vmatmul.mubr.msk.f32.vlgmr.msra.gmra.mrb[16].mxu0 %vm95_vm0, %v799_v12 }
  0x3c   :  { %677 = vmatmul.mubr.msk.f32.vlgmr.msra.gmra.mrb[16].mxu1 %vm95_vm0, %v799_v12  ;;  %416 = vmatprep.mubr.f32.mxu0 %v757_v0 }
  0x3d   :  { %529 = vmatprep.mubr.f32.mxu1 %v757_v0 }
  0x3f   :  { %670 = vmatmul.mubr.msk.f32.gmra.mrb[18].mxu0 %vm95_vm0, %v30_v26 }
  0x40   :  { %678 = vmatmul.mubr.msk.f32.gmra.mrb[18].mxu1 %vm95_vm0, %v30_v26  ;;  %422 = vmatprep.mubr.f32.mxu0 %v757_v0 }
  0x41   :  { %535 = vmatprep.mubr.f32.mxu1 %v757_v0 }
  0x43   :  { %671 = vmatmul.mubr.msk.f32.gmra.mrb[20].mxu0 %vm95_vm0, %v31_v27 }
  0x44   :  { %679 = vmatmul.mubr.msk.f32.gmra.mrb[20].mxu1 %vm95_vm0, %v31_v27  ;;  %428 = vmatprep.mubr.f32.mxu0 %v757_v0 }
  0x45   :  { %541 = vmatprep.mubr.f32.mxu1 %v757_v0 }
  0x47   :  { %672 = vmatmul.mubr.msk.f32.gmra.mrb[22].mxu0 %vm95_vm0, %v32_v28 }
  0x48   :  { %680 = vmatmul.mubr.msk.f32.gmra.mrb[22].mxu1 %vm95_vm0, %v32_v28  ;;  %434 = vmatprep.mubr.f32.mxu0 %v757_v0 }
  0x49   :  { %547 = vmatprep.mubr.f32.mxu1 %v757_v0 }
  0x4b   :  { %673 = vmatmul.mubr.msk.f32.gmra.mrb[24].mxu0 %vm95_vm0, %v33_v29 }
  0x4c   :  { %681 = vmatmul.mubr.msk.f32.gmra.mrb[24].mxu1 %vm95_vm0, %v33_v29  ;;  %440 = vmatprep.mubr.f32.mxu0 %v757_v0 }
  0x4d   :  { %553 = vmatprep.mubr.f32.mxu1 %v757_v0 }
  0x4f   :  { %674 = vmatmul.mubr.msk.f32.gmra.mrb[26].mxu0 %vm95_vm0, %v34_v30 }
  0x50   :  { %682 = vmatmul.mubr.msk.f32.gmra.mrb[26].mxu1 %vm95_vm0, %v34_v30  ;;  %446 = vmatprep.mubr.f32.mxu0 %v757_v0 }
  0x51   :  { %559 = vmatprep.mubr.f32.mxu1 %v757_v0 }
  0x53   :  { %675 = vmatmul.mubr.msk.f32.gmra.mrb[28].mxu0 %vm95_vm0, %v35_v31 }
  0x54   :  { %683 = vmatmul.mubr.msk.f32.gmra.mrb[28].mxu1 %vm95_vm0, %v35_v31  ;;  %452 = vmatprep.mubr.f32.mxu0 %v757_v0 }
  0x55   :  { %565 = vmatprep.mubr.f32.mxu1 %v757_v0 }
  0x57   :  { %676 = vmatmul.mubr.msk.f32.gmra.mrb[30].mxu0 %vm95_vm0, %v36_v32 }
  0x58   :  { %684 = vmatmul.mubr.msk.f32.gmra.mrb[30].mxu1 %vm95_vm0, %v36_v32  ;;  %v73_v32 = vsub.s32 4, %v888_v34 }
  0xee   :  { %v186_v44 = vpop.f32.mrb[0].mxu0 }
  0xef   :  { %v187_v45 = vadd.f32 %v186_v44, %v900_v40  ;;  %v299_v46 = vpop.f32.mrb[0].mxu1  ;;  %v188_v47 = vpop.f32.mrb[1].mxu0 }
  0xf0   :  { %v300_v48 = vadd.f32 %v299_v46, %v903_v41  ;;  %v189_v49 = vadd.f32 %v188_v47, %v906_v42  ;;  %v301_v50 = vpop.f32.mrb[1].mxu1 }
  0xf1   :  { %572 = vst [vmem:[#allocation5] sm:$0xff] %v187_v45  ;;  %v302_v51 = vadd.f32 %v301_v50, %v909_v43  ;;  %v85_v45 = vsub.s32 7, %v888_v34  ;;  %v945_v50 = vrot.slane %v894_v36, %v73_v32  ;;  %v953_v34 = vrot.slane %v894_v36, %v77_v39 }
  0xf2   :  { %574 = vst [vmem:[#allocation5 + $0x10] sm:$0xff] %v300_v48  ;;  %573 = vst [vmem:[#allocation5 + $0x8] sm:$0xff] %v189_v49  ;;  %v192_v52 = vpop.f32.mrb[2].mxu0 }
  0xf3   :  { %575 = vst [vmem:[#allocation5 + $0x18] sm:$0xff] %v302_v51  ;;  %v193_v53 = vadd.f32 %v192_v52, %v900_v40  ;;  %v305_v54 = vpop.f32.mrb[2].mxu1  ;;  %v194_v55 = vpop.f32.mrb[3].mxu0 }
  0xf4   :  { %v306_v56 = vadd.f32 %v305_v54, %v903_v41  ;;  %v195_v57 = vadd.f32 %v194_v55, %v906_v42  ;;  %v307_v58 = vpop.f32.mrb[3].mxu1  ;;  %v950_v54 = vrot.slane %v894_v36, %v81_v38 }
  0xf5   :  { %580 = vst [vmem:[#allocation5 + $0x40] sm:$0xff] %v193_v53  ;;  %v308_v59 = vadd.f32 %v307_v58, %v909_v43 }
  0xf6   :  { %582 = vst [vmem:[#allocation5 + $0x50] sm:$0xff] %v306_v56  ;;  %581 = vst [vmem:[#allocation5 + $0x48] sm:$0xff] %v195_v57  ;;  %v198_v60 = vpop.f32.mrb[4].mxu0 }
  0xf7   :  { %583 = vst [vmem:[#allocation5 + $0x58] sm:$0xff] %v308_v59  ;;  %v199_v61 = vadd.f32 %v198_v60, %v900_v40  ;;  %v311_v62 = vpop.f32.mrb[4].mxu1  ;;  %v200_v63 = vpop.f32.mrb[5].mxu0 }
  0xf8   :  { %v312_v0 = vadd.f32 %v311_v62, %v903_v41  ;;  %v201_v1 = vadd.f32 %v200_v63, %v906_v42  ;;  %v313_v2 = vpop.f32.mrb[5].mxu1 }
  0xf9   :  { %588 = vst [vmem:[#allocation5 + $0x80] sm:$0xff] %v199_v61  ;;  %v314_v3 = vadd.f32 %v313_v2, %v909_v43 }
  0xfa   :  { %590 = vst [vmem:[#allocation5 + $0x90] sm:$0xff] %v312_v0  ;;  %589 = vst [vmem:[#allocation5 + $0x88] sm:$0xff] %v201_v1  ;;  %v204_v4 = vpop.f32.mrb[6].mxu0 }
  0xfb   :  { %591 = vst [vmem:[#allocation5 + $0x98] sm:$0xff] %v314_v3  ;;  %v205_v5 = vadd.f32 %v204_v4, %v900_v40  ;;  %v317_v6 = vpop.f32.mrb[6].mxu1  ;;  %v206_v7 = vpop.f32.mrb[7].mxu0 }
  0xfc   :  { %v318_v8 = vadd.f32 %v317_v6, %v903_v41  ;;  %v207_v9 = vadd.f32 %v206_v7, %v906_v42  ;;  %v319_v10 = vpop.f32.mrb[7].mxu1 }
  0xfd   :  { %596 = vst [vmem:[#allocation5 + $0xc0] sm:$0xff] %v205_v5  ;;  %v320_v11 = vadd.f32 %v319_v10, %v909_v43 }
  0xfe   :  { %598 = vst [vmem:[#allocation5 + $0xd0] sm:$0xff] %v318_v8  ;;  %597 = vst [vmem:[#allocation5 + $0xc8] sm:$0xff] %v207_v9  ;;  %v210_v12 = vpop.f32.mrb[8].mxu0 }
  0xff   :  { %599 = vst [vmem:[#allocation5 + $0xd8] sm:$0xff] %v320_v11  ;;  %v211_v13 = vadd.f32 %v210_v12, %v900_v40  ;;  %v323_v14 = vpop.f32.mrb[8].mxu1  ;;  %v212_v15 = vpop.f32.mrb[9].mxu0 }
 0x100   :  { %v324_v16 = vadd.f32 %v323_v14, %v903_v41  ;;  %v213_v17 = vadd.f32 %v212_v15, %v906_v42  ;;  %v325_v18 = vpop.f32.mrb[9].mxu1 }
 0x101   :  { %604 = vst [vmem:[#allocation5 + $0x100] sm:$0xff] %v211_v13  ;;  %v326_v19 = vadd.f32 %v325_v18, %v909_v43 }
 0x102   :  { %606 = vst [vmem:[#allocation5 + $0x110] sm:$0xff] %v324_v16  ;;  %605 = vst [vmem:[#allocation5 + $0x108] sm:$0xff] %v213_v17  ;;  %v216_v20 = vpop.f32.mrb[10].mxu0 }
 0x103   :  { %607 = vst [vmem:[#allocation5 + $0x118] sm:$0xff] %v326_v19  ;;  %v217_v21 = vadd.f32 %v216_v20, %v900_v40  ;;  %v329_v22 = vpop.f32.mrb[10].mxu1  ;;  %v218_v23 = vpop.f32.mrb[11].mxu0 }
 0x104   :  { %v330_v24 = vadd.f32 %v329_v22, %v903_v41  ;;  %v219_v25 = vadd.f32 %v218_v23, %v906_v42  ;;  %v331_v26 = vpop.f32.mrb[11].mxu1 }
 0x105   :  { %612 = vst [vmem:[#allocation5 + $0x140] sm:$0xff] %v217_v21  ;;  %v332_v27 = vadd.f32 %v331_v26, %v909_v43 }
 0x106   :  { %614 = vst [vmem:[#allocation5 + $0x150] sm:$0xff] %v330_v24  ;;  %613 = vst [vmem:[#allocation5 + $0x148] sm:$0xff] %v219_v25  ;;  %v222_v28 = vpop.f32.mrb[12].mxu0 }
 0x107   :  { %615 = vst [vmem:[#allocation5 + $0x158] sm:$0xff] %v332_v27  ;;  %v223_v29 = vadd.f32 %v222_v28, %v900_v40  ;;  %v335_v30 = vpop.f32.mrb[12].mxu1  ;;  %v224_v31 = vpop.f32.mrb[13].mxu0 }
 0x108   :  { %v336_v33 = vadd.f32 %v335_v30, %v903_v41  ;;  %v225_v35 = vadd.f32 %v224_v31, %v906_v42  ;;  %v337_v37 = vpop.f32.mrb[13].mxu1 }
 0x109   :  { %620 = vst [vmem:[#allocation5 + $0x180] sm:$0xff] %v223_v29  ;;  %v338_v44 = vadd.f32 %v337_v37, %v909_v43 }
 0x10a   :  { %622 = vst [vmem:[#allocation5 + $0x190] sm:$0xff] %v336_v33  ;;  %621 = vst [vmem:[#allocation5 + $0x188] sm:$0xff] %v225_v35  ;;  %v228_v46 = vpop.f32.mrb[14].mxu0 }
 0x10b   :  { %623 = vst [vmem:[#allocation5 + $0x198] sm:$0xff] %v338_v44  ;;  %v229_v47 = vadd.f32 %v228_v46, %v900_v40  ;;  %v341_v48 = vpop.f32.mrb[14].mxu1  ;;  %v230_v49 = vpop.f32.mrb[15].mxu0  ;;  %v957_v40 = vrot.slane %v894_v36, %v85_v45 }
 0x10c   :  { %v342_v51 = vadd.f32 %v341_v48, %v903_v41  ;;  %v231_v52 = vadd.f32 %v230_v49, %v906_v42  ;;  %v343_v53 = vpop.f32.mrb[15].mxu1 }
 0x10d   :  { %628 = vst [vmem:[#allocation5 + $0x1c0] sm:$0xff] %v229_v47  ;;  %v344_v55 = vadd.f32 %v343_v53, %v909_v43 }
 0x10e   :  { %630 = vst [vmem:[#allocation5 + $0x1d0] sm:$0xff] %v342_v51  ;;  %629 = vst [vmem:[#allocation5 + $0x1c8] sm:$0xff] %v231_v52  ;;  %v412_v56 = vpop.f32.mrb[16].mxu0 }
 0x10f   :  { %631 = vst [vmem:[#allocation5 + $0x1d8] sm:$0xff] %v344_v55  ;;  %v413_v41 = vadd.f32 %v412_v56, %v945_v50  ;;  %v525_v42 = vpop.f32.mrb[16].mxu1  ;;  %v414_v57 = vpop.f32.mrb[17].mxu0 }
 0x110   :  { %v526_v58 = vadd.f32 %v525_v42, %v950_v54  ;;  %v415_v59 = vadd.f32 %v414_v57, %v953_v34  ;;  %v527_v60 = vpop.f32.mrb[17].mxu1 }
 0x111   :  { %576 = vst [vmem:[#allocation5 + $0x20] sm:$0xff] %v413_v41  ;;  %v528_v61 = vadd.f32 %v527_v60, %v957_v40 }
 0x112   :  { %578 = vst [vmem:[#allocation5 + $0x30] sm:$0xff] %v526_v58  ;;  %577 = vst [vmem:[#allocation5 + $0x28] sm:$0xff] %v415_v59  ;;  %v418_v36 = vpop.f32.mrb[18].mxu0 }
 0x113   :  { %579 = vst [vmem:[#allocation5 + $0x38] sm:$0xff] %v528_v61  ;;  %v419_v43 = vadd.f32 %v418_v36, %v945_v50  ;;  %v531_v62 = vpop.f32.mrb[18].mxu1  ;;  %v420_v63 = vpop.f32.mrb[19].mxu0 }
 0x114   :  { %v532_v0 = vadd.f32 %v531_v62, %v950_v54  ;;  %v421_v1 = vadd.f32 %v420_v63, %v953_v34  ;;  %v533_v2 = vpop.f32.mrb[19].mxu1 }
 0x115   :  { %584 = vst [vmem:[#allocation5 + $0x60] sm:$0xff] %v419_v43  ;;  %v534_v3 = vadd.f32 %v533_v2, %v957_v40 }
 0x116   :  { %586 = vst [vmem:[#allocation5 + $0x70] sm:$0xff] %v532_v0  ;;  %585 = vst [vmem:[#allocation5 + $0x68] sm:$0xff] %v421_v1  ;;  %v424_v4 = vpop.f32.mrb[20].mxu0 }
 0x117   :  { %587 = vst [vmem:[#allocation5 + $0x78] sm:$0xff] %v534_v3  ;;  %v425_v5 = vadd.f32 %v424_v4, %v945_v50  ;;  %v537_v6 = vpop.f32.mrb[20].mxu1  ;;  %v426_v7 = vpop.f32.mrb[21].mxu0 }
 0x118   :  { %v538_v8 = vadd.f32 %v537_v6, %v950_v54  ;;  %v427_v9 = vadd.f32 %v426_v7, %v953_v34  ;;  %v539_v10 = vpop.f32.mrb[21].mxu1 }
 0x119   :  { %592 = vst [vmem:[#allocation5 + $0xa0] sm:$0xff] %v425_v5  ;;  %v540_v11 = vadd.f32 %v539_v10, %v957_v40 }
 0x11a   :  { %594 = vst [vmem:[#allocation5 + $0xb0] sm:$0xff] %v538_v8  ;;  %593 = vst [vmem:[#allocation5 + $0xa8] sm:$0xff] %v427_v9  ;;  %v430_v12 = vpop.f32.mrb[22].mxu0 }
 0x11b   :  { %595 = vst [vmem:[#allocation5 + $0xb8] sm:$0xff] %v540_v11  ;;  %v431_v13 = vadd.f32 %v430_v12, %v945_v50  ;;  %v543_v14 = vpop.f32.mrb[22].mxu1  ;;  %v432_v15 = vpop.f32.mrb[23].mxu0 }
 0x11c   :  { %v544_v16 = vadd.f32 %v543_v14, %v950_v54  ;;  %v433_v17 = vadd.f32 %v432_v15, %v953_v34  ;;  %v545_v18 = vpop.f32.mrb[23].mxu1 }
 0x11d   :  { %600 = vst [vmem:[#allocation5 + $0xe0] sm:$0xff] %v431_v13  ;;  %v546_v19 = vadd.f32 %v545_v18, %v957_v40 }
 0x11e   :  { %602 = vst [vmem:[#allocation5 + $0xf0] sm:$0xff] %v544_v16  ;;  %601 = vst [vmem:[#allocation5 + $0xe8] sm:$0xff] %v433_v17  ;;  %v436_v20 = vpop.f32.mrb[24].mxu0 }
 0x11f   :  { %603 = vst [vmem:[#allocation5 + $0xf8] sm:$0xff] %v546_v19  ;;  %v437_v21 = vadd.f32 %v436_v20, %v945_v50  ;;  %v549_v22 = vpop.f32.mrb[24].mxu1  ;;  %v438_v23 = vpop.f32.mrb[25].mxu0 }
 0x120   :  { %v550_v24 = vadd.f32 %v549_v22, %v950_v54  ;;  %v439_v25 = vadd.f32 %v438_v23, %v953_v34  ;;  %v551_v26 = vpop.f32.mrb[25].mxu1 }
 0x121   :  { %608 = vst [vmem:[#allocation5 + $0x120] sm:$0xff] %v437_v21  ;;  %v552_v27 = vadd.f32 %v551_v26, %v957_v40 }
 0x122   :  { %610 = vst [vmem:[#allocation5 + $0x130] sm:$0xff] %v550_v24  ;;  %609 = vst [vmem:[#allocation5 + $0x128] sm:$0xff] %v439_v25  ;;  %v442_v28 = vpop.f32.mrb[26].mxu0 }
 0x123   :  { %611 = vst [vmem:[#allocation5 + $0x138] sm:$0xff] %v552_v27  ;;  %v443_v29 = vadd.f32 %v442_v28, %v945_v50  ;;  %v555_v30 = vpop.f32.mrb[26].mxu1  ;;  %v444_v31 = vpop.f32.mrb[27].mxu0 }
 0x124   :  { %v556_v32 = vadd.f32 %v555_v30, %v950_v54  ;;  %v445_v33 = vadd.f32 %v444_v31, %v953_v34  ;;  %v557_v35 = vpop.f32.mrb[27].mxu1 }
 0x125   :  { %616 = vst [vmem:[#allocation5 + $0x160] sm:$0xff] %v443_v29  ;;  %v558_v37 = vadd.f32 %v557_v35, %v957_v40 }
 0x126   :  { %618 = vst [vmem:[#allocation5 + $0x170] sm:$0xff] %v556_v32  ;;  %617 = vst [vmem:[#allocation5 + $0x168] sm:$0xff] %v445_v33  ;;  %v448_v38 = vpop.f32.mrb[28].mxu0 }
 0x127   :  { %619 = vst [vmem:[#allocation5 + $0x178] sm:$0xff] %v558_v37  ;;  %v449_v39 = vadd.f32 %v448_v38, %v945_v50  ;;  %v561_v44 = vpop.f32.mrb[28].mxu1  ;;  %v450_v45 = vpop.f32.mrb[29].mxu0 }
 0x128   :  { %v562_v46 = vadd.f32 %v561_v44, %v950_v54  ;;  %v451_v47 = vadd.f32 %v450_v45, %v953_v34  ;;  %v563_v48 = vpop.f32.mrb[29].mxu1 }
 0x129   :  { %624 = vst [vmem:[#allocation5 + $0x1a0] sm:$0xff] %v449_v39  ;;  %v564_v49 = vadd.f32 %v563_v48, %v957_v40 }
 0x12a   :  { %626 = vst [vmem:[#allocation5 + $0x1b0] sm:$0xff] %v562_v46  ;;  %625 = vst [vmem:[#allocation5 + $0x1a8] sm:$0xff] %v451_v47  ;;  %v454_v51 = vpop.f32.mrb[30].mxu0 }
 0x12b   :  { %627 = vst [vmem:[#allocation5 + $0x1b8] sm:$0xff] %v564_v49  ;;  %v455_v52 = vadd.f32 %v454_v51, %v945_v50  ;;  %v567_v53 = vpop.f32.mrb[30].mxu1  ;;  %v456_v55 = vpop.f32.mrb[31].mxu0 }
 0x12c   :  { %v568_v56 = vadd.f32 %v567_v53, %v950_v54  ;;  %v457_v41 = vadd.f32 %v456_v55, %v953_v34  ;;  %v569_v42 = vpop.f32.mrb[31].mxu1 }
 0x12d   :  { %632 = vst [vmem:[#allocation5 + $0x1e0] sm:$0xff] %v455_v52  ;;  %v570_v57 = vadd.f32 %v569_v42, %v957_v40 }
 0x12e   :  { %634 = vst [vmem:[#allocation5 + $0x1f0] sm:$0xff] %v568_v56  ;;  %633 = vst [vmem:[#allocation5 + $0x1e8] sm:$0xff] %v457_v41 }
 0x12f   :  { %635 = vst [vmem:[#allocation5 + $0x1f8] sm:$0xff] %v570_v57 }
 0x130   :  { %739 = shalt.err (!%p736_p12)
}
 0x131   :  { %s740_s19 = scalar_lea.hbm %s1009_s3, 8192 }
 0x132   :  { %p741_p13 = scmp.ne.s32.totalorder %s1009_s3, %s740_s19  ;;  %p744_p0 = scmp.lt.u32.totalorder %s740_s19, %s1009_s3 }
 0x134   :  { %p746_p1 = pnand %p744_p0, %p741_p13 }
 0x136   :  { %749 = shalt.err (!%p746_p1)
}
 0x137   :  { %647 = dma.vmem_to_hbm [thread:$0]  %s642_s15, 8192, %s1009_s3, [#allocation4], %s755_s22, %s755_s22, %s756_s23  }
 0x138   :  { %752 = dma.done.wait [#allocation4], 8192  }
 0x139   :  { %753 = vsyncadd [#allocation4], 4294959104 }
 0x13a   :  { %651 = vsyncpa [#allocation3], 1 }
 0x13b   :  { %652 = vsyncpa [#allocation4], 1 }

</bundles_post_ra>
